<compile_context>
chip_gen: v5e
topology: v5e:2x2
jax: 0.10.0
libtpu: 0.0.40
codegen_flags: <defaults>
</compile_context>

<pallas_src>
from functools import partial

import jax
import jax.numpy as jnp
from jax.experimental import pallas as pl
from jax.experimental.pallas import tpu as pltpu


def _matmul_relu_kernel(p_ref, w_ref, o_ref):
    """Pure dense matmul + ReLU (im2col already done in the wrapper).

    p_ref: (B_blk, 9*Cin, M)   transposed im2col patches, M = H_out*W_out
    w_ref: (Cout, 9*Cin)       conv weights as matmul LHS
    o_ref: (B_blk, Cout, M)    lane-dense output (last dim M = 256 here)
    """
    w = w_ref[...]
    for b in range(o_ref.shape[0]):        # static unroll; B_blk is small
        acc = jnp.dot(w, p_ref[b], preferred_element_type=jnp.float32)
        o_ref[b] = jnp.maximum(acc, 0.0).astype(o_ref.dtype)


def prepare_weight(weight_oihw):
    """OIHW -> (Cout, 9*Cin) with column order (kh, kw, cin).

    Hoisted out of the per-call path (call once per layer).
    """
    cout, cin, kh, kw = weight_oihw.shape
    assert (kh, kw) == (3, 3), "Conv module uses kernel_size=3"
    return jnp.transpose(weight_oihw, (0, 2, 3, 1)).reshape(cout, 9 * cin)


@partial(jax.jit, static_argnames="stride")
def conv3x3_relu(x_nchw, w_mat, stride=1):
    """Forward pass of the Conv module.

    x_nchw: (N, Cin, H, W)
    w_mat:  (Cout, 9*Cin)   from prepare_weight()
    returns (N, Cout, H_out, W_out) with padding=1, given stride.
    """
    N, Cin, H, W = x_nchw.shape
    Cout = w_mat.shape[0]
    assert w_mat.shape[1] == 9 * Cin

    Ho = (H + 2 - 3) // stride + 1
    Wo = (W + 2 - 3) // stride + 1
    M = Ho * Wo

    # padding=1 (zero pad); fuses with the tap gather below inside this jit.
    xp = jnp.pad(x_nchw, ((0, 0), (0, 0), (1, 1), (1, 1)))

    # im2col hoisted to the wrapper: 9 shifted (strided) taps, stacked so the
    # column order is (kh, kw, cin), matching prepare_weight().
    taps = []
    for kh in range(3):
        for kw in range(3):
            taps.append(
                xp[:, :,
                   kh:kh + (Ho - 1) * stride + 1:stride,
                   kw:kw + (Wo - 1) * stride + 1:stride])     # (N, Cin, Ho, Wo)
    # (N, 9, Cin, Ho, Wo) -> (N, 9*Cin, M); contiguous reshape, no transpose.
    p = jnp.stack(taps, axis=1).reshape(N, 9 * Cin, M)

    # Batch block: smallest divisor of N giving >= ~512 output columns of
    # matmul work per grid step (amortizes per-step pipeline overhead).
    b_blk = N
    for d in range(1, N + 1):
        if N % d == 0:
            b_blk = d
            if d * M >= 512:
                break
    grid = (N // b_blk,)

    out = pl.pallas_call(
        _matmul_relu_kernel,
        out_shape=jax.ShapeDtypeStruct((N, Cout, M), x_nchw.dtype),
        grid=grid,
        in_specs=[
            pl.BlockSpec((b_blk, 9 * Cin, M), lambda i: (i, 0, 0)),
            pl.BlockSpec((Cout, 9 * Cin), lambda i: (0, 0)),
        ],
        out_specs=pl.BlockSpec((b_blk, Cout, M), lambda i: (i, 0, 0)),
        compiler_params=pltpu.CompilerParams(
            dimension_semantics=("parallel",)),
    )(p, w_mat)

    # (N, Cout, M) -> NCHW directly (reshape only, no transpose).
    return out.reshape(N, Cout, Ho, Wo)


def _reference(x_nchw, weight_oihw, stride=1):
    """Plain-JAX reference (for correctness check only)."""
    out = jax.lax.conv_general_dilated(
        x_nchw.astype(jnp.float32), weight_oihw.astype(jnp.float32),
        window_strides=(stride, stride), padding=((1, 1), (1, 1)),
        dimension_numbers=("NCHW", "OIHW", "NCHW"))
    return jnp.maximum(out, 0.0).astype(x_nchw.dtype)


if __name__ == "__main__":
    # Module config: Conv(n_in=4, n_out=8, stride=1); input NCHW (2, 4, 16, 16).
    n_in, n_out = 4, 8
    key = jax.random.PRNGKey(0)
    kx, kw = jax.random.split(key)

    x = jax.random.normal(kx, (2, n_in, 16, 16), dtype=jnp.float32)
    # Deterministic Kaiming-like init for Conv2d weight (Cout, Cin, 3, 3), bias=False.
    fan_in = n_in * 3 * 3
    weight = jax.random.normal(kw, (n_out, n_in, 3, 3), dtype=jnp.float32) * (2.0 / fan_in) ** 0.5

    w_mat = prepare_weight(weight)          # hoisted: done once, not per call
    out = conv3x3_relu(x, w_mat)
    out = jax.block_until_ready(out)

    ref = _reference(x, weight)
    assert out.shape == (2, n_out, 16, 16), out.shape
    assert jnp.allclose(out, ref, atol=1e-4, rtol=1e-4), "mismatch vs reference"

    print("KERNEL_OK")
</pallas_src>

<mosaic_0001>
module attributes {stable_mosaic.version = 11 : i64} {
  func.func @_matmul_relu_kernel(%arg0: i32, %arg1: memref<2x36x256xf32, #tpu.memory_space<vmem>>, %arg2: memref<8x36xf32, #tpu.memory_space<vmem>>, %arg3: memref<2x8x256xf32, #tpu.memory_space<vmem>>) attributes {dimension_semantics = [#tpu.dimension_semantics<parallel>], iteration_bounds = array<i64: 1>, scalar_prefetch = 0 : i64, scratch_operands = 0 : i64, tpu.core_type = #tpu.core_type<tc>, window_params = [{transform_indices = @transform_0, window_bounds = array<i64: 2, 36, 256>}, {pipeline_mode = #tpu.pipeline_mode<synchronous>, transform_indices = @transform_1, window_bounds = array<i64: 8, 36>}, {transform_indices = @transform_2, window_bounds = array<i64: 2, 8, 256>}]} {
    %c0 = arith.constant 0 : index
    %c0_0 = arith.constant 0 : index
    %0 = vector.load %arg2[%c0, %c0_0] : memref<8x36xf32, #tpu.memory_space<vmem>>, vector<8x36xf32>
    %c0_1 = arith.constant 0 : index
    %c0_2 = arith.constant 0 : index
    %c0_3 = arith.constant 0 : index
    %1 = vector.load %arg1[%c0_1, %c0_2, %c0_3] : memref<2x36x256xf32, #tpu.memory_space<vmem>>, vector<1x36x256xf32>
    %2 = vector.shape_cast %1 : vector<1x36x256xf32> to vector<36x256xf32>
    %cst = arith.constant dense<0.000000e+00> : vector<8x256xf32>
    %3 = tpu.matmul %0, %2, %cst {dimension_numbers = #tpu.dot_dimension_numbers<[1], [0], [0], [1], [0, 0, 1, 1], [], []>} : vector<8x36xf32>, vector<36x256xf32>, vector<8x256xf32> -> vector<8x256xf32>
    %cst_4 = arith.constant 0.000000e+00 : f32
    %4 = vector.broadcast %cst_4 : f32 to vector<8x256xf32>
    %5 = arith.maximumf %3, %4 : vector<8x256xf32>
    %c0_5 = arith.constant 0 : index
    %c0_6 = arith.constant 0 : index
    %c0_7 = arith.constant 0 : index
    %6 = vector.load %arg3[%c0_5, %c0_6, %c0_7] : memref<2x8x256xf32, #tpu.memory_space<vmem>>, vector<1x8x256xf32>
    %7 = vector.shape_cast %6 : vector<1x8x256xf32> to vector<8x256xf32>
    %8 = vector.shape_cast %5 : vector<8x256xf32> to vector<1x8x256xf32>
    tpu.vector_store %arg3[%c0_5, %c0_6, %c0_7], %8 {strides = array<i32>} : memref<2x8x256xf32, #tpu.memory_space<vmem>>, vector<1x8x256xf32>,
    %c1 = arith.constant 1 : index
    %c0_8 = arith.constant 0 : index
    %c0_9 = arith.constant 0 : index
    %9 = vector.load %arg1[%c1, %c0_8, %c0_9] : memref<2x36x256xf32, #tpu.memory_space<vmem>>, vector<1x36x256xf32>
    %10 = vector.shape_cast %9 : vector<1x36x256xf32> to vector<36x256xf32>
    %cst_10 = arith.constant dense<0.000000e+00> : vector<8x256xf32>
    %11 = tpu.matmul %0, %10, %cst_10 {dimension_numbers = #tpu.dot_dimension_numbers<[1], [0], [0], [1], [0, 0, 1, 1], [], []>} : vector<8x36xf32>, vector<36x256xf32>, vector<8x256xf32> -> vector<8x256xf32>
    %cst_11 = arith.constant 0.000000e+00 : f32
    %12 = vector.broadcast %cst_11 : f32 to vector<8x256xf32>
    %13 = arith.maximumf %11, %12 : vector<8x256xf32>
    %c1_12 = arith.constant 1 : index
    %c0_13 = arith.constant 0 : index
    %c0_14 = arith.constant 0 : index
    %14 = vector.load %arg3[%c1_12, %c0_13, %c0_14] : memref<2x8x256xf32, #tpu.memory_space<vmem>>, vector<1x8x256xf32>
    %15 = vector.shape_cast %14 : vector<1x8x256xf32> to vector<8x256xf32>
    %16 = vector.shape_cast %13 : vector<8x256xf32> to vector<1x8x256xf32>
    tpu.vector_store %arg3[%c1_12, %c0_13, %c0_14], %16 {strides = array<i32>} : memref<2x8x256xf32, #tpu.memory_space<vmem>>, vector<1x8x256xf32>,
    return
  }
  func.func @transform_0(%arg0: i32) -> (i32, i32, i32) {
    %c0_i32 = arith.constant 0 : i32
    %c0_i32_0 = arith.constant 0 : i32
    %c0_i32_1 = arith.constant 0 : i32
    return %arg0, %c0_i32, %c0_i32_0 : i32, i32, i32
  }
  func.func @transform_1(%arg0: i32) -> (i32, i32) {
    %c0_i32 = arith.constant 0 : i32
    %c0_i32_0 = arith.constant 0 : i32
    %c0_i32_1 = arith.constant 0 : i32
    return %c0_i32, %c0_i32_0 : i32, i32
  }
  func.func @transform_2(%arg0: i32) -> (i32, i32, i32) {
    %c0_i32 = arith.constant 0 : i32
    %c0_i32_0 = arith.constant 0 : i32
    %c0_i32_1 = arith.constant 0 : i32
    return %arg0, %c0_i32, %c0_i32_0 : i32, i32, i32
  }
}

</mosaic_0001>

<bundles_post_ra>
// kernel: conv3x3_relu.1
= control target key start
LH: loop header
LB: loop body
LE: loop exit
PB: predicated region body
PF: predicated region fallthrough
CT: control target
= control target key end

     0   :  { %vm26_vm0 = vcmask 1043456   ;;  %vm22_vm1 = vcmask 293888   ;;  %s261_s0 = inlined_call_operand.vmem [shape: f32[2,36,256], index: 0, kind: input, shape index: {}]   ;;  %s262_s1 = inlined_call_operand.vmem [shape: f32[8,36], index: 1, kind: input, shape index: {}]   ;;  %s263_s2 = inlined_call_operand.vmem [shape: f32[2,8,256], index: 2, kind: output, shape index: {}]  }
   0x1   :  { %v155_v0 = vld [vmem:[%s261_s0 + $0x90] sm:$0xf]  ;;  %v156_v1 = vld [vmem:[%s261_s0 + $0x98] sm:$0xf]  ;;  %v153_v2 = vld [vmem:[%s261_s0 + $0x80] sm:$0xff] }
   0x2   :  { %157 = vmatpush.msk.msra.mxu2 %vm26_vm0, %v155_v0  ;;  %159 = vmatpush.msk.msra.mxu3 %vm26_vm0, %v156_v1  ;;  %v154_v3 = vld [vmem:[%s261_s0 + $0x88] sm:$0xff]  ;;  %v151_v4 = vld [vmem:[%s261_s0 + $0x70] sm:$0xff]  ;;  %v152_v5 = vld [vmem:[%s261_s0 + $0x78] sm:$0xff] }
   0x3   :  { %v20_v6 = vld [vmem:[%s261_s0 + $0x40] sm:$0xf]  ;;  %v21_v7 = vld [vmem:[%s261_s0 + $0x48] sm:$0xf]  ;;  %v18_v8 = vld [vmem:[%s261_s0 + $0x30] sm:$0xff] }
   0x4   :  { %106 = vmatpush.msra.mxu2 %v153_v2  ;;  %126 = vmatpush.msra.mxu3 %v154_v3  ;;  %v19_v9 = vld [vmem:[%s261_s0 + $0x38] sm:$0xff]  ;;  %v149_v10 = vld [vmem:[%s261_s0 + $0x60] sm:$0xff]  ;;  %v150_v11 = vld [vmem:[%s261_s0 + $0x68] sm:$0xff] }
   0x5   :  { %143 = vmatpush.msk.msra.mxu0 %vm26_vm0, %v20_v6  ;;  %145 = vmatpush.msk.msra.mxu1 %vm26_vm0, %v21_v7  ;;  %v16_v12 = vld [vmem:[%s261_s0 + $0x20] sm:$0xff]  ;;  %v17_v13 = vld [vmem:[%s261_s0 + $0x28] sm:$0xff]  ;;  %v147_v14 = vld [vmem:[%s261_s0 + $0x50] sm:$0xff] }
   0x6   :  { %107 = vmatpush.msra.mxu2 %v151_v4  ;;  %127 = vmatpush.msra.mxu3 %v152_v5  ;;  %v148_v15 = vld [vmem:[%s261_s0 + $0x58] sm:$0xff]  ;;  %v11_v16 = vld [vmem:[%s262_s1] sm:$0xff]  ;;  %v14_v17 = vld [vmem:[%s261_s0 + $0x10] sm:$0xff] }
   0x7   :  { %45 = vmatpush.msra.mxu0 %v18_v8  ;;  %65 = vmatpush.msra.mxu1 %v19_v9  ;;  %v15_v18 = vld [vmem:[%s261_s0 + $0x18] sm:$0xff]  ;;  %v12_v19 = vld [vmem:[%s261_s0] sm:$0xff]  ;;  %v13_v20 = vld [vmem:[%s261_s0 + $0x8] sm:$0xff] }
   0x8   :  { %108 = vmatpush.msra.mxu2 %v149_v10  ;;  %128 = vmatpush.msra.mxu3 %v150_v11 }
   0x9   :  { %46 = vmatpush.msra.mxu0 %v16_v12  ;;  %66 = vmatpush.msra.mxu1 %v17_v13 }
   0xa   :  { %109 = vmatpush.msra.mxu2 %v147_v14  ;;  %129 = vmatpush.msra.mxu3 %v148_v15 }
   0xb   :  { %158 = vmatmul.msk.f32.vlgmr.msra.gmra.mxu2 %vm22_vm1, %v11_v16  ;;  %160 = vmatmul.msk.f32.vlgmr.msra.gmra.mxu3 %vm22_vm1, %v11_v16 }
   0xc   :  { %47 = vmatpush.msra.mxu0 %v14_v17  ;;  %67 = vmatpush.msra.mxu1 %v15_v18 }
   0xe   :  { %48 = vmatpush.msra.mxu0 %v12_v19  ;;  %68 = vmatpush.msra.mxu1 %v13_v20 }
   0xf   :  { %144 = vmatmul.msk.f32.vlgmr.msra.gmra.mxu0 %vm22_vm1, %v11_v16  ;;  %146 = vmatmul.msk.f32.vlgmr.msra.gmra.mxu1 %vm22_vm1, %v11_v16 }
  0x8c   :  { %v50_v21 = vpop.f32.mrf.mxu0  ;;  %v70_v22 = vpop.f32.mrf.mxu1 }
  0x8d   :  { %v73_v23 = vmax.f32 %v50_v21, 0.0  ;;  %v74_v24 = vmax.f32 %v70_v22, 0.0 }
  0x8e   :  { %v111_v25 = vpop.f32.mrf.mxu2  ;;  %v131_v26 = vpop.f32.mrf.mxu3 }
  0x8f   :  { %75 = vst [vmem:[%s263_s2] sm:$0xff] %v73_v23  ;;  %v134_v27 = vmax.f32 %v111_v25, 0.0  ;;  %v135_v28 = vmax.f32 %v131_v26, 0.0 }
  0x90   :  { %76 = vst [vmem:[%s263_s2 + $0x8] sm:$0xff] %v74_v24 }
  0x91   :  { %161 = vst [vmem:[%s263_s2 + $0x10] sm:$0xff] %v134_v27 }
  0x92   :  { %162 = vst [vmem:[%s263_s2 + $0x18] sm:$0xff] %v135_v28 }

</bundles_post_ra>
